<compile_context>
chip_gen: v6e
topology: v6e:2x2x1
jax: 0.10.0
libtpu: 0.0.40
codegen_flags: <defaults>
</compile_context>

<pallas_src>
import functools

import jax
import jax.numpy as jnp
from jax.experimental import pallas as pl
from jax.experimental.pallas import tpu as pltpu


_VMEM_LIMIT_BYTES = 48 * 1024 * 1024  # above 32 MiB default, below v7x 64 MiB physical


def ln_qkv_kernel(x_ref, g_ref, b_ref, wqkv_ref, q_ref, k_ref, v_ref, *,
                  inner, scale, eps):
    """LayerNorm + fused QKV projection for one (batch, seq-tile) block."""
    x = x_ref[0].astype(jnp.float32)                     # (Tn, D)
    g = g_ref[...].astype(jnp.float32)                   # (1, D)
    b = b_ref[...].astype(jnp.float32)                   # (1, D)

    # PyTorch LayerNorm semantics: biased variance, eps inside rsqrt.
    mean = jnp.mean(x, axis=-1, keepdims=True)
    var = jnp.mean(jnp.square(x - mean), axis=-1, keepdims=True)
    xn = (x - mean) * jax.lax.rsqrt(var + eps) * g + b   # (Tn, D), f32

    # MXU matmul in compute dtype with f32 accumulation.
    xn = xn.astype(wqkv_ref.dtype)
    qkv = jnp.dot(xn, wqkv_ref[...], preferred_element_type=jnp.float32)

    # Fold the 1/sqrt(dh) softmax scale into q here (cheap: N*inner elements)
    # instead of scaling the N^2 score matrix later.
    q_ref[0] = (qkv[:, 0 * inner:1 * inner] * scale).astype(q_ref.dtype)
    k_ref[0] = qkv[:, 1 * inner:2 * inner].astype(k_ref.dtype)
    v_ref[0] = qkv[:, 2 * inner:3 * inner].astype(v_ref.dtype)


def flash_attn_kernel(q_ref, k_ref, v_ref, wout_ref, o_ref,
                      m_ref, l_ref, acc_ref):
    """Flash attention + fused output projection.

    Grid: (batch, q_tiles, kv_tiles); kv axis innermost, "arbitrary".
    q_ref: (1, H, Tq, dh)   k_ref/v_ref: (1, H, Tk, dh)
    wout_ref: (H, dh, D)    o_ref: (1, Tq, D)
    Scratch (f32): m_ref/l_ref: (H, Tq, 1), acc_ref: (H, Tq, dh)
    """
    ki = pl.program_id(2)

    @pl.when(ki == 0)
    def _init():
        m_ref[...] = jnp.full(m_ref.shape, -jnp.inf, dtype=jnp.float32)
        l_ref[...] = jnp.zeros(l_ref.shape, dtype=jnp.float32)
        acc_ref[...] = jnp.zeros(acc_ref.shape, dtype=jnp.float32)

    q = q_ref[0]                                         # (H, Tq, dh), compute dtype
    k = k_ref[0]                                         # (H, Tk, dh)
    v = v_ref[0]                                         # (H, Tk, dh)

    # Scores (q already carries the softmax scale); batched over heads, no .T.
    s = jnp.einsum('hqd,hkd->hqk', q, k,
                   preferred_element_type=jnp.float32)   # (H, Tq, Tk), f32

    m_prev = m_ref[...]
    m_new = jnp.maximum(m_prev, jnp.max(s, axis=-1, keepdims=True))
    alpha = jnp.exp(m_prev - m_new)                      # (H, Tq, 1)
    p = jnp.exp(s - m_new)                               # (H, Tq, Tk)

    l_ref[...] = alpha * l_ref[...] + jnp.sum(p, axis=-1, keepdims=True)
    pv = jnp.einsum('hqk,hkd->hqd', p.astype(v.dtype), v,
                    preferred_element_type=jnp.float32)  # (H, Tq, dh)
    acc_ref[...] = alpha * acc_ref[...] + pv
    m_ref[...] = m_new

    @pl.when(ki == pl.num_programs(2) - 1)
    def _finalize():
        out = acc_ref[...] * pl.reciprocal(l_ref[...], approx=True)  # (H, Tq, dh)
        out = out.astype(wout_ref.dtype)
        heads = out.shape[0]
        # Output projection: sum_h out[h] @ W_out[h]. Static unroll over heads,
        # executed once per q-tile (finalize only), f32 accumulation.
        y = jnp.dot(out[0], wout_ref[0], preferred_element_type=jnp.float32)
        for h in range(1, heads):
            y = y + jnp.dot(out[h], wout_ref[h],
                            preferred_element_type=jnp.float32)
        o_ref[0] = y.astype(o_ref.dtype)


def _pick_tile(n, target, align=16):
    """Largest divisor of n that is <= target and a multiple of `align`
    (falls back to the full dimension, which is always a legal block)."""
    if n <= target:
        return n
    for t in range(min(target, n), 0, -1):
        if n % t == 0 and t % align == 0:
            return t
    return n


def attention_forward(x, gamma, beta, w_qkv_t, w_out_t, *, heads, dim_head,
                      compute_dtype=jnp.bfloat16,
                      q_tile=256, kv_tile=512, proj_tile=512):
    B, N, D = x.shape
    inner = heads * dim_head
    assert w_qkv_t.shape == (D, 3 * inner)
    assert w_out_t.shape == (inner, D)

    cd = compute_dtype
    wqkv_c = w_qkv_t.astype(cd)
    wout_h = w_out_t.astype(cd).reshape(heads, dim_head, D)   # head-major W_out

    # ---------------- Stage 1: LayerNorm + QKV projection ----------------
    tn = _pick_tile(N, proj_tile)
    qkv_out_spec = pl.BlockSpec((1, tn, inner), lambda bb, t: (bb, t, 0))
    q, k, v = pl.pallas_call(
        functools.partial(ln_qkv_kernel, inner=inner,
                          scale=float(dim_head) ** -0.5, eps=1e-5),
        out_shape=[jax.ShapeDtypeStruct((B, N, inner), cd)] * 3,
        grid=(B, N // tn),
        in_specs=[
            pl.BlockSpec((1, tn, D), lambda bb, t: (bb, t, 0)),       # x
            pl.BlockSpec((1, D), lambda bb, t: (0, 0)),               # ln gamma
            pl.BlockSpec((1, D), lambda bb, t: (0, 0)),               # ln beta
            pl.BlockSpec((D, 3 * inner), lambda bb, t: (0, 0)),       # W_qkv^T
        ],
        out_specs=[qkv_out_spec] * 3,
        compiler_params=pltpu.CompilerParams(
            dimension_semantics=("parallel", "parallel"),
            vmem_limit_bytes=_VMEM_LIMIT_BYTES),
    )(x, gamma, beta, wqkv_c)

    # Head-major rearrangement (b n (h d) -> b h n d) done once at the XLA
    # level so the attention kernel never reshapes/transposes in its hot loop.
    def to_heads(t):
        return t.reshape(B, N, heads, dim_head).transpose(0, 2, 1, 3)

    qh, kh, vh = to_heads(q), to_heads(k), to_heads(v)

    # ------------- Stage 2: flash attention + output projection -------------
    tq = _pick_tile(N, q_tile)
    tk = _pick_tile(N, kv_tile)
    out = pl.pallas_call(
        flash_attn_kernel,
        out_shape=jax.ShapeDtypeStruct((B, N, D), x.dtype),
        grid=(B, N // tq, N // tk),
        in_specs=[
            pl.BlockSpec((1, heads, tq, dim_head),
                         lambda bb, qi, ki: (bb, 0, qi, 0)),          # q
            pl.BlockSpec((1, heads, tk, dim_head),
                         lambda bb, qi, ki: (bb, 0, ki, 0)),          # k
            pl.BlockSpec((1, heads, tk, dim_head),
                         lambda bb, qi, ki: (bb, 0, ki, 0)),          # v
            pl.BlockSpec((heads, dim_head, D),
                         lambda bb, qi, ki: (0, 0, 0)),               # W_out (head-major)
        ],
        out_specs=pl.BlockSpec((1, tq, D), lambda bb, qi, ki: (bb, qi, 0)),
        scratch_shapes=[
            pltpu.VMEM((heads, tq, 1), jnp.float32),         # running max m
            pltpu.VMEM((heads, tq, 1), jnp.float32),         # running sum l
            pltpu.VMEM((heads, tq, dim_head), jnp.float32),  # output accumulator
        ],
        compiler_params=pltpu.CompilerParams(
            dimension_semantics=("parallel", "parallel", "arbitrary"),
            vmem_limit_bytes=_VMEM_LIMIT_BYTES),
    )(qh, kh, vh, wout_h)
    return out


def reference_forward(x, gamma, beta, w_qkv_t, w_out_t, *, heads, dim_head):
    """Pure-JAX f32 reference mirroring the PyTorch forward."""
    eps = 1e-5
    mean = jnp.mean(x, axis=-1, keepdims=True)
    var = jnp.mean((x - mean) ** 2, axis=-1, keepdims=True)
    xn = (x - mean) / jnp.sqrt(var + eps) * gamma[0] + beta[0]
    qkv = xn @ w_qkv_t
    q, k, v = jnp.split(qkv, 3, axis=-1)

    def split_heads(t):
        B, N, _ = t.shape
        return t.reshape(B, N, heads, dim_head).transpose(0, 2, 1, 3)

    q, k, v = map(split_heads, (q, k, v))
    dots = jnp.einsum("bhnd,bhmd->bhnm", q, k) * (dim_head ** -0.5)
    attn = jax.nn.softmax(dots, axis=-1)
    out = jnp.einsum("bhnm,bhmd->bhnd", attn, v)
    B, H, N, Dh = out.shape
    out = out.transpose(0, 2, 1, 3).reshape(B, N, H * Dh)
    return out @ w_out_t


if __name__ == "__main__":
    # Small, module-consistent shapes; N=32 with tile=16 so both the seq tiling
    # and the online-softmax kv loop take >1 step.
    B, N, D = 2, 32, 32
    heads, dim_head = 2, 16
    inner = heads * dim_head

    key = jax.random.PRNGKey(0)
    kx, kq, ko = jax.random.split(key, 3)

    x = jax.random.normal(kx, (B, N, D), dtype=jnp.float32)
    gamma = jnp.ones((1, D), dtype=jnp.float32)   # nn.LayerNorm default init
    beta = jnp.zeros((1, D), dtype=jnp.float32)
    # Linear weights, stored transposed: (in_features, out_features).
    w_qkv_t = jax.random.normal(kq, (D, 3 * inner), dtype=jnp.float32) * 0.05
    w_out_t = jax.random.normal(ko, (inner, D), dtype=jnp.float32) * 0.05

    y_ref = reference_forward(x, gamma, beta, w_qkv_t, w_out_t,
                              heads=heads, dim_head=dim_head)

    # f32 compute path: tight correctness check.
    y32 = attention_forward(x, gamma, beta, w_qkv_t, w_out_t,
                            heads=heads, dim_head=dim_head,
                            compute_dtype=jnp.float32,
                            q_tile=16, kv_tile=16, proj_tile=16)
    y32 = jax.block_until_ready(y32)
    assert y32.shape == (B, N, D)
    assert jnp.allclose(y32, y_ref, atol=2e-3, rtol=2e-3), (
        float(jnp.max(jnp.abs(y32 - y_ref))))

    # bf16 MXU path (default): looser tolerance, f32 accumulation inside.
    ybf = attention_forward(x, gamma, beta, w_qkv_t, w_out_t,
                            heads=heads, dim_head=dim_head,
                            compute_dtype=jnp.bfloat16,
                            q_tile=16, kv_tile=16, proj_tile=16)
    ybf = jax.block_until_ready(ybf)
    assert ybf.shape == (B, N, D)
    assert jnp.allclose(ybf, y_ref, atol=2e-2, rtol=2e-2), (
        float(jnp.max(jnp.abs(ybf - y_ref))))

    print("KERNEL_OK")
</pallas_src>

<mosaic_0001>
module attributes {stable_mosaic.version = 11 : i64} {
  func.func @ln_qkv_kernel(%arg0: i32, %arg1: i32, %arg2: memref<1x16x32xf32, #tpu.memory_space<vmem>>, %arg3: memref<1x32xf32, #tpu.memory_space<vmem>>, %arg4: memref<1x32xf32, #tpu.memory_space<vmem>>, %arg5: memref<32x96xf32, #tpu.memory_space<vmem>>, %arg6: memref<1x16x32xf32, #tpu.memory_space<vmem>>, %arg7: memref<1x16x32xf32, #tpu.memory_space<vmem>>, %arg8: memref<1x16x32xf32, #tpu.memory_space<vmem>>) attributes {dimension_semantics = [#tpu.dimension_semantics<parallel>, #tpu.dimension_semantics<parallel>], iteration_bounds = array<i64: 2, 2>, scalar_prefetch = 0 : i64, scratch_operands = 0 : i64, tpu.core_type = #tpu.core_type<tc>, window_params = [{transform_indices = @transform_0, window_bounds = array<i64: 1, 16, 32>}, {pipeline_mode = #tpu.pipeline_mode<synchronous>, transform_indices = @transform_1, window_bounds = array<i64: 1, 32>}, {pipeline_mode = #tpu.pipeline_mode<synchronous>, transform_indices = @transform_2, window_bounds = array<i64: 1, 32>}, {pipeline_mode = #tpu.pipeline_mode<synchronous>, transform_indices = @transform_3, window_bounds = array<i64: 32, 96>}, {transform_indices = @transform_4, window_bounds = array<i64: 1, 16, 32>}, {transform_indices = @transform_5, window_bounds = array<i64: 1, 16, 32>}, {transform_indices = @transform_6, window_bounds = array<i64: 1, 16, 32>}]} {
    %c0 = arith.constant 0 : index
    %c0_0 = arith.constant 0 : index
    %c0_1 = arith.constant 0 : index
    %0 = vector.load %arg2[%c0, %c0_0, %c0_1] : memref<1x16x32xf32, #tpu.memory_space<vmem>>, vector<1x16x32xf32>
    %1 = vector.shape_cast %0 : vector<1x16x32xf32> to vector<16x32xf32>
    %c0_2 = arith.constant 0 : index
    %c0_3 = arith.constant 0 : index
    %2 = vector.load %arg3[%c0_2, %c0_3] : memref<1x32xf32, #tpu.memory_space<vmem>>, vector<1x32xf32>
    %c0_4 = arith.constant 0 : index
    %c0_5 = arith.constant 0 : index
    %3 = vector.load %arg4[%c0_4, %c0_5] : memref<1x32xf32, #tpu.memory_space<vmem>>, vector<1x32xf32>
    %cst = arith.constant dense<0.000000e+00> : vector<16xf32>
    %4 = vector.multi_reduction <add>, %1, %cst [1] : vector<16x32xf32> to vector<16xf32>
    %5 = vector.shape_cast %4 : vector<16xf32> to vector<16x1xf32>
    %cst_6 = arith.constant 3.200000e+01 : f32
    %6 = vector.broadcast %cst_6 : f32 to vector<16x1xf32>
    %7 = arith.divf %5, %6 : vector<16x1xf32>
    %8 = vector.broadcast %7 : vector<16x1xf32> to vector<16x32xf32>
    %9 = arith.subf %1, %8 : vector<16x32xf32>
    %10 = arith.mulf %9, %9 : vector<16x32xf32>
    %cst_7 = arith.constant dense<0.000000e+00> : vector<16xf32>
    %11 = vector.multi_reduction <add>, %10, %cst_7 [1] : vector<16x32xf32> to vector<16xf32>
    %12 = vector.shape_cast %11 : vector<16xf32> to vector<16x1xf32>
    %cst_8 = arith.constant 3.200000e+01 : f32
    %13 = vector.broadcast %cst_8 : f32 to vector<16x1xf32>
    %14 = arith.divf %12, %13 : vector<16x1xf32>
    %15 = vector.broadcast %7 : vector<16x1xf32> to vector<16x32xf32>
    %16 = arith.subf %1, %15 : vector<16x32xf32>
    %cst_9 = arith.constant 9.99999974E-6 : f32
    %17 = vector.broadcast %cst_9 : f32 to vector<16x1xf32>
    %18 = arith.addf %14, %17 : vector<16x1xf32>
    %19 = math.rsqrt %18 : vector<16x1xf32>
    %20 = vector.broadcast %19 : vector<16x1xf32> to vector<16x32xf32>
    %21 = arith.mulf %16, %20 : vector<16x32xf32>
    %22 = vector.broadcast %2 : vector<1x32xf32> to vector<16x32xf32>
    %23 = arith.mulf %21, %22 : vector<16x32xf32>
    %24 = vector.broadcast %3 : vector<1x32xf32> to vector<16x32xf32>
    %25 = arith.addf %23, %24 : vector<16x32xf32>
    %c0_10 = arith.constant 0 : index
    %c0_11 = arith.constant 0 : index
    %26 = vector.load %arg5[%c0_10, %c0_11] : memref<32x96xf32, #tpu.memory_space<vmem>>, vector<32x96xf32>
    %cst_12 = arith.constant dense<0.000000e+00> : vector<16x96xf32>
    %27 = tpu.matmul %25, %26, %cst_12 {dimension_numbers = #tpu.dot_dimension_numbers<[1], [0], [0], [1], [0, 0, 1, 1], [], []>} : vector<16x32xf32>, vector<32x96xf32>, vector<16x96xf32> -> vector<16x96xf32>
    %28 = vector.extract_strided_slice %27 {offsets = [0, 0], sizes = [16, 32], strides = [1, 1]} : vector<16x96xf32> to vector<16x32xf32>
    %cst_13 = arith.constant 2.500000e-01 : f32
    %29 = vector.broadcast %cst_13 : f32 to vector<16x32xf32>
    %30 = arith.mulf %28, %29 : vector<16x32xf32>
    %c0_14 = arith.constant 0 : index
    %c0_15 = arith.constant 0 : index
    %c0_16 = arith.constant 0 : index
    %31 = vector.load %arg6[%c0_14, %c0_15, %c0_16] : memref<1x16x32xf32, #tpu.memory_space<vmem>>, vector<1x16x32xf32>
    %32 = vector.shape_cast %31 : vector<1x16x32xf32> to vector<16x32xf32>
    %33 = vector.shape_cast %30 : vector<16x32xf32> to vector<1x16x32xf32>
    tpu.vector_store %arg6[%c0_14, %c0_15, %c0_16], %33 {strides = array<i32>} : memref<1x16x32xf32, #tpu.memory_space<vmem>>, vector<1x16x32xf32>,
    %34 = vector.extract_strided_slice %27 {offsets = [0, 32], sizes = [16, 32], strides = [1, 1]} : vector<16x96xf32> to vector<16x32xf32>
    %c0_17 = arith.constant 0 : index
    %c0_18 = arith.constant 0 : index
    %c0_19 = arith.constant 0 : index
    %35 = vector.load %arg7[%c0_17, %c0_18, %c0_19] : memref<1x16x32xf32, #tpu.memory_space<vmem>>, vector<1x16x32xf32>
    %36 = vector.shape_cast %35 : vector<1x16x32xf32> to vector<16x32xf32>
    %37 = vector.shape_cast %34 : vector<16x32xf32> to vector<1x16x32xf32>
    tpu.vector_store %arg7[%c0_17, %c0_18, %c0_19], %37 {strides = array<i32>} : memref<1x16x32xf32, #tpu.memory_space<vmem>>, vector<1x16x32xf32>,
    %38 = vector.extract_strided_slice %27 {offsets = [0, 64], sizes = [16, 32], strides = [1, 1]} : vector<16x96xf32> to vector<16x32xf32>
    %c0_20 = arith.constant 0 : index
    %c0_21 = arith.constant 0 : index
    %c0_22 = arith.constant 0 : index
    %39 = vector.load %arg8[%c0_20, %c0_21, %c0_22] : memref<1x16x32xf32, #tpu.memory_space<vmem>>, vector<1x16x32xf32>
    %40 = vector.shape_cast %39 : vector<1x16x32xf32> to vector<16x32xf32>
    %41 = vector.shape_cast %38 : vector<16x32xf32> to vector<1x16x32xf32>
    tpu.vector_store %arg8[%c0_20, %c0_21, %c0_22], %41 {strides = array<i32>} : memref<1x16x32xf32, #tpu.memory_space<vmem>>, vector<1x16x32xf32>,
    return
  }
  func.func @transform_0(%arg0: i32, %arg1: i32) -> (i32, i32, i32) {
    %c0_i32 = arith.constant 0 : i32
    %c0_i32_0 = arith.constant 0 : i32
    return %arg0, %arg1, %c0_i32 : i32, i32, i32
  }
  func.func @transform_1(%arg0: i32, %arg1: i32) -> (i32, i32) {
    %c0_i32 = arith.constant 0 : i32
    %c0_i32_0 = arith.constant 0 : i32
    %c0_i32_1 = arith.constant 0 : i32
    return %c0_i32, %c0_i32_0 : i32, i32
  }
  func.func @transform_2(%arg0: i32, %arg1: i32) -> (i32, i32) {
    %c0_i32 = arith.constant 0 : i32
    %c0_i32_0 = arith.constant 0 : i32
    %c0_i32_1 = arith.constant 0 : i32
    return %c0_i32, %c0_i32_0 : i32, i32
  }
  func.func @transform_3(%arg0: i32, %arg1: i32) -> (i32, i32) {
    %c0_i32 = arith.constant 0 : i32
    %c0_i32_0 = arith.constant 0 : i32
    %c0_i32_1 = arith.constant 0 : i32
    return %c0_i32, %c0_i32_0 : i32, i32
  }
  func.func @transform_4(%arg0: i32, %arg1: i32) -> (i32, i32, i32) {
    %c0_i32 = arith.constant 0 : i32
    %c0_i32_0 = arith.constant 0 : i32
    return %arg0, %arg1, %c0_i32 : i32, i32, i32
  }
  func.func @transform_5(%arg0: i32, %arg1: i32) -> (i32, i32, i32) {
    %c0_i32 = arith.constant 0 : i32
    %c0_i32_0 = arith.constant 0 : i32
    return %arg0, %arg1, %c0_i32 : i32, i32, i32
  }
  func.func @transform_6(%arg0: i32, %arg1: i32) -> (i32, i32, i32) {
    %c0_i32 = arith.constant 0 : i32
    %c0_i32_0 = arith.constant 0 : i32
    return %arg0, %arg1, %c0_i32 : i32, i32, i32
  }
}

</mosaic_0001>

<bundles_post_ra>
// kernel: tpu_custom_call.1
= control target key start
LH: loop header
LB: loop body
LE: loop exit
PB: predicated region body
PF: predicated region fallthrough
CT: control target
= control target key end

     0   :  { %s1439_s0 = inlined_call_operand.hbm [shape: f32[2,32,32], index: 0, kind: input, shape index: {}]   ;;  %s1440_s1 = inlined_call_operand.vmem [shape: f32[1,32], index: 1, kind: input, shape index: {}]   ;;  %s1441_s2 = inlined_call_operand.vmem [shape: f32[1,32], index: 2, kind: input, shape index: {}]   ;;  %s1442_s3 = inlined_call_operand.hbm [shape: f32[32,96], index: 3, kind: input, shape index: {}]   ;;  %s1443_s4 = inlined_call_operand.hbm [shape: f32[2,32,32], index: 4, kind: output, shape index: {0}]   ;;  %s1444_s5 = inlined_call_operand.hbm [shape: f32[2,32,32], index: 5, kind: output, shape index: {1}]   ;;  %s1445_s6 = inlined_call_operand.hbm [shape: f32[2,32,32], index: 6, kind: output, shape index: {2}]  }
   0x1   :  { %1456 = sst [smem:[#allocation19_spill]] %s1442_s3 }
   0x2   :  { %1457 = sst [smem:[#allocation20_spill]] %s1443_s4 }
   0x3   :  { %1458 = sst [smem:[#allocation21_spill]] %s1444_s5 }
   0x4   :  { %1459 = sst [smem:[#allocation22_spill]] %s1445_s6 }
   0x5   :  { %12 = vsyncpa [#allocation3], 0 }
   0x6   :  { %14 = vsyncpa [#allocation3 + $0x1], 0 }
   0x7   :  { %15 = vsyncpa [#allocation6], 0 }
   0x8   :  { %16 = vsyncpa [#allocation4], 0 }
   0x9   :  { %18 = vsyncpa [#allocation4 + $0x1], 0 }
   0xa   :  { %19 = vsyncpa [#allocation9], 0 }
   0xb   :  { %21 = vsyncpa [#allocation9 + $0x1], 0  ;;  %s1130_s21 = smov 0   ;;  %s1132_s22 = smov 0  }
   0xc   :  { %s1134_s23 = smov 0   ;;  %s1136_s24 = smov 0  }
   0xd   :  { %s1138_s25 = smov 0   ;;  %s1140_s26 = smov 0  }
   0xe   :  { %s1142_s27 = smov 0   ;;  %s1144_s28 = smov 0  }
   0xf LB: > { %1460 = sst [smem:[#allocation15_spill]] %s1054_s21  ;;  %s1171_s29 = sadd.s32 4294967295, %s1082_s28   ;;  %s1082_s28 = sphi %s1144_s28, %s27_s28   ;;  %s1078_s27 = sphi %s1142_s27, %s1488_s27   ;;  %s1074_s26 = sphi %s1140_s26, %s1483_s26   ;;  %s1070_s25 = sphi %s1138_s25, %s1487_s25   ;;  %s1066_s24 = sphi %s1136_s24, %s1482_s24   ;;  %s1062_s23 = sphi %s1134_s23, %s1486_s23   ;;  %s1058_s22 = sphi %s1132_s22, %s1485_s22   ;;  %s1054_s21 = sphi %s1130_s21, %s1484_s21  }
  0x10   : > { %1461 = sst [smem:[#allocation16_spill]] %s1074_s26  ;;  %s1446_s30 = sadd.s32 4294967294, %s1082_s28  }
  0x11   : > { %p61_p0 = scmp.ne.s32.totalorder %s1058_s22, %s1054_s21  ;;  %p62_p1 = scmp.eq.s32.totalorder %s1171_s29, 0 }
  0x12   : > { %p156_p3 = scmp.eq.s32.totalorder %s1446_s30, 3  ;;  %p715_p5 = scmp.ge.s32.totalorder %s1082_s28, 1 }
  0x13   : > { %p1182_p4 = por %p62_p1, %p61_p0  ;;  %p219_p7 = scmp.lt.s32.totalorder %s1082_s28, 5 }
  0x14   : > { %p1187_p6 = por %p156_p3, %p61_p0  ;;  %s1084_s10 = smov [#allocation5]  }
  0x15   : > { %p1192_p8 = pnand %p715_p5, %p219_p7  ;;  %s237_s11 = sshll.u32 %s1084_s10, 4  ;;  %s238_s11 = int_to_ptr.vmem [resolvable:$true] %s237_s11 }
  0x16   : > { %s1463_s8 = scalar_select %p1187_p6, 1, 0 }
  0x17   : > { %p775_p9 = pneg %p1192_p8  ;;  %s883_s12 = scalar_lea.vmem %s238_s11, 512 }
  0x18   : > { %1464 = sst [smem:[#allocation17_spill]] %s1463_s8  ;;  %p884_p12 = scmp.ne.s32.totalorder %s238_s11, %s883_s12 }
  0x19   : > { %p776_p10 = pnand %p775_p9, %p62_p1  ;;  %p891_p3 = scmp.lt.s32.totalorder %s238_s11, %s238_s11 }
  0x1a   : > { %p892_p2 = scmp.lt.s32.totalorder %s883_s12, %s883_s12 }
  0x1b   : > { %p874_p11 = pneg %p776_p10 }
  0x1c   : > { %p893_p6 = por %p892_p2, %p891_p3 }
  0x1d   : > { %p886_p13 = pnand %p884_p12, %p874_p11 }
  0x1f   : > { %p887_p0 = pneg %p886_p13 }
  0x21   : > { %p894_p5 = pnand %p893_p6, %p887_p0 }
  0x23   : > { %897 = shalt.err (!%p894_p5)
}
  0x24   : > { %s1447_s13 = smov 128   ;;  %s1448_s14 = smov 8  }
  0x25   : > { %s1466_s3 = sld [smem:[#allocation19_spill]]  ;;  %s36_s17 = sadd.s32 1, %s1074_s26 }
  0x26   : > { %p37_p2 = scmp.ge.s32.totalorder %s36_s17, 2  ;;  %s39_s18 = sadd.s32 1, %s1078_s27 }
  0x27   : > { %s48_s19 = sadd.s32 1, %s1062_s23  ;;  %p55_p6 = scmp.ne.s32.totalorder %s1062_s23, %s1058_s22 }
  0x28   : > { %s1490_s17 = smov (%p37_p2, %s36_s17), 0  ;;  %s1492_s18 = smov (!%p37_p2, %s39_s18), %s1078_s27 }
  0x29   : > { %1467 = sst [smem:[#allocation18_spill]] %s1490_s17  ;;  %s44_s20 = ssub.s32 %s1074_s26, %s1490_s17 }
  0x2a   : > { %p56_p7 = scmp.eq.s32.totalorder %s1082_s28, 0  ;;  %p41_p9 = scmp.ge.s32.totalorder %s1492_s18, 2 }
  0x2b   : > { %778 = dma.hbm_to_vmem [thread:$0]  (!%p776_p10), %s1466_s3, 512, %s238_s11, [#allocation6], %s1447_s13, %s1447_s13, %s1448_s14  }
  0x2c   : > { %p1468_p11 = scmp.eq.s32.totalorder %s1171_s29, 3  ;;  %p1223_p10 = por %p56_p7, %p55_p6 }
  0x2d   : > { %p794_p13 = scmp.lt.s32.totalorder %s1082_s28, 4  ;;  %s1494_s18 = smov (%p41_p9, %s1492_s18), 0 }
  0x2e   : > { %p1219_p12 = por %p1468_p11, %p55_p6  ;;  %s251_s12 = sand.u32 1, %s1062_s23  }
  0x2f   : > { %s719_s15 = sshll.u32 %s1074_s26, 1  ;;  %s43_s16 = ssub.s32 %s1078_s27, %s1494_s18 }
  0x30   : > { %s45_s30 = sor.u32 %s44_s20, %s43_s16  ;;  %s718_s13 = sshll.u32 %s251_s12, 4 }
  0x31   : > { %p46_p0 = scmp.eq.s32.totalorder %s45_s30, 0  ;;  %s720_s14 = sshll.u32 %s1078_s27, 2 }
  0x32   : > { %s255_s3 = scalar_lea.vmem [#allocation2], %s718_s13  ;;  %s261_s21 = sadd.s32 %s720_s14, %s719_s15 }
  0x33   : > { %s264_s17 = sshll.u32 %s255_s3, 4  ;;  %s721_s6 = sshll.u32 %s261_s21, 7  ;;  %s265_s17 = int_to_ptr.vmem [resolvable:$true] %s264_s17 }
  0x34   : > { %s1236_s8 = scalar_select %p46_p0, %s1062_s23, %s48_s19  }
  0x35   : > { %p1242_p3 = pnand %p794_p13, %p1223_p10  ;;  %s263_s20 = scalar_lea.hbm %s1439_s0, %s721_s6 }
  0x36   : > { %s252_s30 = scalar_lea.sflag [#allocation3], %s251_s12  ;;  %s911_s3 = scalar_lea.vmem %s265_s17, 256 }
  0x37   : > { %p900_p5 = pneg %p1242_p3  ;;  %p912_p2 = scmp.ne.s32.totalorder %s265_s17, %s911_s3 }
  0x38   : > { %s1087_s13 = smov [#allocation2]  }
  0x39   : > { %p914_p6 = pnand %p912_p2, %p900_p5  ;;  %s916_s21 = sshll.u32 %s1087_s13, 4  ;;  %s917_s21 = int_to_ptr.vmem [resolvable:$false] %s916_s21 }
  0x3a   : > { %s918_s14 = scalar_lea.vmem %s917_s21, 512  ;;  %p919_p9 = scmp.lt.s32.totalorder %s265_s17, %s917_s21 }
  0x3b   : > { %p915_p7 = pneg %p914_p6  ;;  %p920_p11 = scmp.lt.s32.totalorder %s918_s14, %s911_s3 }
  0x3d   : > { %p921_p10 = por %p920_p11, %p919_p9 }
  0x3f   : > { %p922_p13 = pnand %p921_p10, %p915_p7 }
  0x41   : > { %925 = shalt.err (!%p922_p13)
}
  0x42   : > { %s1472_s4 = smov 8   ;;  %s1473_s6 = smov 128  }
  0x43   : > { %782 = dma.hbm_to_vmem [thread:$0]  (!%p1242_p3), %s263_s20, 256, %s265_s17, %s252_s30, %s1473_s6, %s1473_s6, %s1472_s4  }
  0x44   : > { %276 = sbr.rel (%p1192_p8) target bundleno = 735 (0x2df), region = 36  ;;  %s1259_s26 = sand.u32 (!%p1192_p8), 1, %s1058_s22  }
  0x45   : > { %s1262_s19 = sshll.u32 (!%p1192_p8), %s1259_s26, 4  ;;  %s279_s11 = scalar_lea.sflag (!%p1192_p8), [#allocation3], %s1259_s26 }
  0x46   : > { %s282_s12 = scalar_lea.vmem (!%p1192_p8), [#allocation2], %s1262_s19 }
  0x49   : > { %1037 = dma.done.wait (%p1182_p4), %s279_s11, 256  }
  0x4a   : > { %1039 = vsyncadd (%p1182_p4), %s279_s11, 4294967040 }
  0x4b   : > { %1041 = dma.done.wait (%p62_p1), [#allocation6], 512  }
  0x4c   : > { %1043 = vsyncadd (%p62_p1), [#allocation6], 4294966784  ;;  %vm333_vm0 = vcmask 261120   ;;  %v329_v0 = vld [vmem:[%s282_s12] sm:$0xff]  ;;  %v330_v1 = vld [vmem:[%s282_s12 + $0x8] sm:$0xff]  ;;  %s735_s15 = sshll.u32 %s1066_s24, 1 }
  0x4d   : > { %v334_v2 = vsel %vm333_vm0, %v329_v0, 0.0  ;;  %v337_v3 = vsel %vm333_vm0, %v330_v1, 0.0  ;;  %v380_v14 = vld [vmem:[#allocation5 + $0x18] sm:$0xff]  ;;  %v379_v15 = vld [vmem:[#allocation5 + $0x10] sm:$0xff]  ;;  %v378_v16 = vld [vmem:[#allocation5 + $0x8] sm:$0xff]  ;;  %s736_s16 = sshll.u32 %s1070_s25, 2 }
  0x4e   : > { %335 = vadd.xlane.f32.xlu0 %v334_v2  ;;  %752 = vmatprep.subr.mxu0 %v380_v14  ;;  %v377_v17 = vld [vmem:[#allocation5] sm:$0xff]  ;;  %s507_s20 = sadd.s32 %s736_s16, %s735_s15  ;;  %s310_s3 = scalar_lea.vmem [#allocation7], %s1262_s19 }
  0x4f   : > { %753 = vmatpush3.msra.mxu0 %v380_v14  ;;  %v728_v25 = vld [vmem:[%s1440_s1] ss:$0 sm:$0xff]  ;;  %s1288_s30 = sshll.u32 %s507_s20, 7  ;;  %s510_s13 = sshll.u32 %s310_s3, 4  ;;  %s1298_s13 = int_to_ptr.vmem [resolvable:$true] %s510_s13 }
  0x50   : > { %754 = vmatprep.subr.mxu0 %v379_v15  ;;  %v729_v27 = vld [vmem:[%s1441_s2] ss:$0 sm:$0xff]  ;;  %s1088_s21 = smov 96   ;;  %s1474_s25 = sld [smem:[#allocation20_spill]] }
  0x51   : > { %755 = vmatpush3.msra.mxu0 %v379_v15  ;;  %s1089_s11 = smov 64   ;;  %s485_s12 = scalar_lea.sflag [#allocation4], %s1259_s26 }
  0x52   : > { %338 = vadd.xlane.f32.xlu0 %v337_v3  ;;  %756 = vmatprep.subr.mxu0 %v378_v16  ;;  %s926_s5 = scalar_lea.vmem %s1298_s13, 256  ;;  %s1090_s7 = smov [#allocation7]  }
  0x53   : > { %757 = vmatpush3.msra.mxu0 %v378_v16  ;;  %p927_p1 = scmp.ne.s32.totalorder %s1298_s13, %s926_s5  ;;  %s930_s9 = sshll.u32 %s1090_s7, 4  ;;  %s931_s9 = int_to_ptr.vmem [resolvable:$false] %s930_s9 }
  0x54   : > { %758 = vmatprep.subr.mxu0 %v377_v17  ;;  %s932_s17 = scalar_lea.vmem %s931_s9, 512  ;;  %p933_p0 = scmp.lt.s32.totalorder %s1298_s13, %s931_s9 }
  0x55   : > { %759 = vmatpush3.msra.mxu0 %v377_v17  ;;  %p928_p4 = pnand %p927_p1, %p1219_p12  ;;  %p934_p3 = scmp.lt.s32.totalorder %s932_s17, %s926_s5 }
  0x56   : > { %s1475_s4 = smov %s1474_s25  ;;  %s1296_s6 = scalar_lea.hbm %s1474_s25, %s1288_s30 }
  0x57   : > { %p929_p8 = pneg %p928_p4  ;;  %p935_p5 = por %p934_p3, %p933_p0 }
  0x59   : > { %p936_p2 = pnand %p935_p5, %p929_p8 }
  0xd7   : > { %v336_v4 = vpop.xlane.xlu0 %335 }
  0xd8   : > { %v341_v5 = vmul.f32 0.03125, %v336_v4 }
  0xda   : > { %v343_v6 = vsub.f32 %v329_v0, %v341_v5 }
  0xdb   : > { %v339_v7 = vpop.xlane.xlu0 %338 }
  0xdc   : > { %v342_v8 = vmul.f32 0.03125, %v339_v7  ;;  %v345_v9 = vmul.f32 %v343_v6, %v343_v6 }
  0xde   : > { %v344_v10 = vsub.f32 %v330_v1, %v342_v8  ;;  %v347_v11 = vsel %vm333_vm0, %v345_v9, 0.0 }
  0xdf   : > { %348 = vadd.xlane.f32.xlu1 %v347_v11 }
  0xe0   : > { %v346_v12 = vmul.f32 %v344_v10, %v344_v10 }
  0xe2   : > { %v350_v13 = vsel %vm333_vm0, %v346_v12, 0.0 }
  0xe3   : > { %351 = vadd.xlane.f32.xlu1 %v350_v13 }
 0x168   : > { %v349_v18 = vpop.xlane.xlu1 %348 }
 0x169   : > { %v353_v19 = vmul.f32 0.03125, %v349_v18 }
 0x16b   : > { %v355_v20 = vadd.f32 1e-05, %v353_v19 }
 0x16c   : > { %v352_v21 = vpop.xlane.xlu1 %351 }
 0x16d   : > { %868 = vrsqrt.f32 %v355_v20  ;;  %v354_v22 = vmul.f32 0.03125, %v352_v21 }
 0x16f   : > { %v356_v23 = vadd.f32 1e-05, %v354_v22 }
 0x171   : > { %870 = vrsqrt.f32 %v356_v23 }
 0x17a   : > { %v869_v24 = vpop.eup %868 }
 0x17b   : > { %v359_v26 = vmul.f32 %v869_v24, %v343_v6 }
 0x17d   : > { %v367_v28 = vmul.f32 %v728_v25, %v359_v26 }
 0x17e   : > { %v871_v29 = vpop.eup %870 }
 0x17f   : > { %v360_v30 = vmul.f32 %v871_v29, %v344_v10  ;;  %v375_v31 = vadd.f32 %v729_v27, %v367_v28 }
 0x181   : > { %v368_v32 = vmul.f32 %v728_v25, %v360_v30  ;;  %760 = vmatprep.mubr.msk.f32.mxu0 %vm333_vm0, %v375_v31 }
 0x183   : > { %v376_v33 = vadd.f32 %v729_v27, %v368_v32 }
 0x185   : > { %761 = vmatmul.mubr.msk.f32.vlgmr.msra.gmra.mxu0 %vm333_vm0, %v376_v33 }
 0x245   : > { %v762_v34 = vpop.f32.mrf.mxu0 }
 0x246   : > { %v463_v35 = vmul.f32 0.25, %v762_v34  ;;  %470 = vrot.lane.b32.xlu1 %v762_v34, %s1088_s21 }
 0x247   : > { %v453_v36 = vpop.f32.mrf.mxu0 }
 0x248   : > { %465 = vst.msk [vmem:[%s310_s3 + $0x8] sm:$0xff] %vm333_vm0, %v463_v35  ;;  %v462_v37 = vmul.f32 0.25, %v453_v36  ;;  %468 = vrot.lane.b32.xlu0 %v453_v36, %s1088_s21 }
 0x24a   : > { %464 = vst.msk [vmem:[%s310_s3] sm:$0xff] %vm333_vm0, %v462_v37  ;;  %476 = vrot.lane.b32.xlu1 %v453_v36, %s1089_s11 }
 0x24b   : > { %939 = shalt.err (!%p936_p2)
}
 0x24c   : > { %s940_s15 = scalar_lea.hbm %s1296_s6, 256  ;;  %s944_s3 = scalar_lea.hbm %s1475_s4, 1024 }
 0x24d   : > { %p941_p6 = scmp.ne.s32.totalorder %s1296_s6, %s940_s15  ;;  %p945_p11 = scmp.lt.s32.totalorder %s1296_s6, %s1475_s4 }
 0x24e   : > { %p946_p10 = scmp.lt.s32.totalorder %s944_s3, %s940_s15 }
 0x24f   : > { %p942_p7 = pnand %p941_p6, %p1219_p12 }
 0x250   : > { %p947_p13 = por %p946_p10, %p945_p11 }
 0x251   : > { %p943_p9 = pneg %p942_p7 }
 0x253   : > { %p948_p1 = pnand %p947_p13, %p943_p9 }
 0x255   : > { %951 = shalt.err (!%p948_p1)
}
 0x256   : > { %s1091_s24 = smov 128   ;;  %s1092_s25 = smov 8   ;;  %478 = vrot.lane.b32.xlu1 %v762_v34, %s1089_s11 }
 0x257   : > { %769 = dma.vmem_to_hbm [thread:$0]  (%p1219_p12), %s1298_s13, 256, %s1296_s6, %s485_s12, %s1091_s24, %s1091_s24, %s1092_s25  }
 0x258   : > { %s317_s5 = scalar_lea.vmem [#allocation8], %s1262_s19  ;;  %s489_s9 = sand.u32 1, %s1171_s29  }
 0x259   : > { %s528_s7 = sshll.u32 %s317_s5, 4  ;;  %s1476_s16 = sld [smem:[#allocation21_spill]]  ;;  %s1331_s7 = int_to_ptr.vmem [resolvable:$true] %s528_s7 }
 0x25a   : > { %s1342_s26 = scalar_lea.vmem [#allocation10], %s1262_s19  ;;  %s1345_s13 = scalar_lea.sflag [#allocation9], %s489_s9 }
 0x25b   : > { %s546_s29 = sshll.u32 %s1342_s26, 4  ;;  %s952_s6 = scalar_lea.vmem %s1331_s7, 256  ;;  %s1375_s29 = int_to_ptr.vmem [resolvable:$true] %s546_s29 }
 0x25c   : > { %p953_p4 = scmp.ne.s32.totalorder %s1331_s7, %s952_s6  ;;  %s1093_s11 = smov [#allocation8]  }
 0x25d   : > { %s956_s12 = sshll.u32 %s1093_s11, 4  ;;  %s957_s12 = int_to_ptr.vmem [resolvable:$false] %s956_s12 }
 0x25e   : > { %p954_p8 = pnand %p953_p4, %p1219_p12  ;;  %s958_s3 = scalar_lea.vmem %s957_s12, 512 }
 0x25f   : > { %s1338_s20 = scalar_lea.hbm %s1476_s16, %s1288_s30  ;;  %p959_p3 = scmp.lt.s32.totalorder %s1331_s7, %s957_s12 }
 0x260   : > { %p955_p0 = pneg %p954_p8  ;;  %p960_p5 = scmp.lt.s32.totalorder %s958_s3, %s952_s6 }
 0x262   : > { %p961_p2 = por %p960_p5, %p959_p3 }
 0x264   : > { %p962_p6 = pnand %p961_p2, %p955_p0 }
 0x2b8   : > { %v471_v38 = vpop.permute.xlu1 %470 }
 0x2b9   : > { %475 = vst.msk [vmem:[%s317_s5 + $0x8] sm:$0xff] %vm333_vm0, %v471_v38 }
 0x2ba   : > { %v469_v39 = vpop.permute.xlu0 %468 }
 0x2bb   : > { %474 = vst.msk [vmem:[%s317_s5] sm:$0xff] %vm333_vm0, %v469_v39 }
 0x2bc   : > { %v477_v40 = vpop.permute.xlu1 %476 }
 0x2bd   : > { %965 = shalt.err (!%p962_p6)
}
 0x2be   : > { %s966_s19 = scalar_lea.hbm %s1338_s20, 256  ;;  %s970_s5 = scalar_lea.hbm %s1476_s16, 1024 }
 0x2bf   : > { %p967_p7 = scmp.ne.s32.totalorder %s1338_s20, %s966_s19  ;;  %p971_p10 = scmp.lt.s32.totalorder %s1338_s20, %s1476_s16 }
 0x2c0   : > { %p972_p13 = scmp.lt.s32.totalorder %s970_s5, %s966_s19 }
 0x2c1   : > { %p968_p9 = pnand %p967_p7, %p1219_p12 }
 0x2c2   : > { %p973_p1 = por %p972_p13, %p971_p10 }
 0x2c3   : > { %p969_p11 = pneg %p968_p9 }
 0x2c5   : > { %p974_p4 = pnand %p973_p1, %p969_p11 }
 0x2c7   : > { %977 = shalt.err (!%p974_p4)
}
 0x2c8   : > { %770 = dma.vmem_to_hbm [thread:$0]  (%p1219_p12), %s1331_s7, 256, %s1338_s20, %s1345_s13, %s1091_s24, %s1091_s24, %s1092_s25   ;;  %v479_v41 = vpop.permute.xlu1 %478 }
 0x2c9   : > { %482 = vst.msk [vmem:[%s1342_s26] sm:$0xff] %vm333_vm0, %v477_v40  ;;  %s1477_s11 = sld [smem:[#allocation22_spill]]  ;;  %483 = vst.msk [vmem:[%s1342_s26 + $0x8] sm:$0xff] %vm333_vm0, %v479_v41  ;;  %s978_s3 = scalar_lea.vmem %s1375_s29, 256 }
 0x2ca   : > { %p979_p8 = scmp.ne.s32.totalorder %s1375_s29, %s978_s3  ;;  %s1094_s7 = smov [#allocation10]  }
 0x2cb   : > { %s982_s20 = sshll.u32 %s1094_s7, 4  ;;  %s983_s20 = int_to_ptr.vmem [resolvable:$false] %s982_s20 }
 0x2cc   : > { %p980_p0 = pnand %p979_p8, %p1219_p12  ;;  %s984_s19 = scalar_lea.vmem %s983_s20, 512 }
 0x2cd   : > { %p985_p5 = scmp.lt.s32.totalorder %s1375_s29, %s983_s20  ;;  %p986_p2 = scmp.lt.s32.totalorder %s984_s19, %s978_s3 }
 0x2ce   : > { %p981_p3 = pneg %p980_p0 }
 0x2cf   : > { %s1381_s12 = scalar_lea.hbm %s1477_s11, %s1288_s30  ;;  %p987_p6 = por %p986_p2, %p985_p5 }
 0x2d1   : > { %p988_p7 = pnand %p987_p6, %p981_p3 }
 0x2d3   : > { %991 = shalt.err (!%p988_p7)
}
 0x2d4   : > { %s992_s30 = scalar_lea.hbm %s1381_s12, 256  ;;  %s996_s14 = scalar_lea.hbm %s1477_s11, 1024 }
 0x2d5   : > { %p993_p9 = scmp.ne.s32.totalorder %s1381_s12, %s992_s30  ;;  %p997_p13 = scmp.lt.s32.totalorder %s1381_s12, %s1477_s11 }
 0x2d6   : > { %p998_p1 = scmp.lt.s32.totalorder %s996_s14, %s992_s30 }
 0x2d7   : > { %p994_p11 = pnand %p993_p9, %p1219_p12 }
 0x2d8   : > { %p999_p4 = por %p998_p1, %p997_p13 }
 0x2d9   : > { %p995_p10 = pneg %p994_p11 }
 0x2db   : > { %p1000_p8 = pnand %p999_p4, %p995_p10 }
 0x2dd   : > { %1003 = shalt.err (!%p1000_p8)
}
 0x2de   : > { %771 = dma.vmem_to_hbm [thread:$0]  (%p1219_p12), %s1375_s29, 256, %s1381_s12, %s1345_s13, %s1091_s24, %s1091_s24, %s1092_s25  }
 0x2df PF: > { %s1478_s17 = sld [smem:[#allocation15_spill]]  ;;  %p796_p0 = scmp.ge.s32.totalorder %s1082_s28, 2 }
 0x2e0   : > { %s1479_s15 = sld [smem:[#allocation17_spill]] }
 0x2e5   : > { %s561_s6 = sand.u32 1, %s1478_s17  }
 0x2e6   : > { %p1480_p3 = scmp.ne.s32.totalorder %s1479_s15, 0  ;;  %s562_s3 = scalar_lea.sflag [#allocation4], %s561_s6 }
 0x2e8   : > { %p784_p5 = pnand %p796_p0, %p1480_p3 }
 0x2ea   : > { %p785_p2 = pneg %p784_p5 }
 0x2ec   : > { %1045 = dma.done.wait (%p785_p2), %s562_s3, 256  }
 0x2ed   : > { %1047 = vsyncadd (%p785_p2), %s562_s3, 4294967040  ;;  %s1481_s10 = sadd.s32 4294967294, %s1082_s28  }
 0x2ee   : > { %s570_s7 = sand.u32 1, %s1481_s10  }
 0x2ef   : > { %s571_s20 = scalar_lea.sflag [#allocation9], %s570_s7 }
 0x2f0   : > { %1049 = dma.done.wait (%p785_p2), %s571_s20, 512  }
 0x2f1   : > { %1051 = vsyncadd (%p785_p2), %s571_s20, 4294966784  ;;  %s27_s28 = sadd.s32 1, %s1082_s28   ;;  %s1482_s24 = sld [smem:[#allocation16_spill]] }
 0x2f2   : > { %p24_p12 = scmp.ge.s32.totalorder %s27_s28, 6   ;;  %s1483_s26 = sld [smem:[#allocation18_spill]] }
 0x2f3   : > { %s1484_s21 = smov %s1058_s22  ;;  %s1485_s22 = smov %s1062_s23 }
 0x2f4   : > { %s1486_s23 = smov %s1236_s8  ;;  %s1487_s25 = smov %s1078_s27 }
 0x2f5   : > { %s1488_s27 = smov %s1494_s18  ;;  %26 = sbr.rel (!%p24_p12) target bundleno = 15 (0xf), region = 117 }
 0x2fa   :  { %585 = vsyncpa [#allocation3], 1 }
 0x2fb   :  { %587 = vsyncpa [#allocation3 + $0x1], 1 }
 0x2fc   :  { %588 = vsyncpa [#allocation6], 1 }
 0x2fd   :  { %589 = vsyncpa [#allocation4], 1 }
 0x2fe   :  { %591 = vsyncpa [#allocation4 + $0x1], 1 }
 0x2ff   :  { %592 = vsyncpa [#allocation9], 1 }
 0x300   :  { %594 = vsyncpa [#allocation9 + $0x1], 1 }

</bundles_post_ra>
